<compile_context>
chip_gen: v5e
topology: v5e:2x2
jax: 0.10.0
libtpu: 0.0.40
codegen_flags: <defaults>
</compile_context>

<pallas_src>
import jax
import jax.numpy as jnp
from jax.experimental import pallas as pl
from jax.experimental.pallas import tpu as pltpu


def _mlp_kernel(xt_ref, w1_ref, b1_ref, w2_ref, b2_ref, ot_ref):
    # fc1 (transposed): (hidden, in) @ (in, tm) -> (hidden, tm), f32 accumulate on MXU
    h = jnp.dot(w1_ref[...], xt_ref[...], preferred_element_type=jnp.float32)
    h = h + b1_ref[...]                      # (hidden, 1) broadcasts across token lanes
    # Exact GELU (PyTorch nn.GELU default): 0.5*x*(1+erf(x/sqrt(2))), kept in f32
    h = 0.5 * h * (1.0 + jax.lax.erf(h * jnp.float32(0.7071067811865476)))
    # dropout(p=0.0) -> identity
    # fc2 (transposed): (out, hidden) @ (hidden, tm) -> (out, tm)
    o = jnp.dot(w2_ref[...], h.astype(w2_ref.dtype),
                preferred_element_type=jnp.float32)
    o = o + b2_ref[...]
    # dropout(p=0.0) -> identity
    ot_ref[...] = o.astype(ot_ref.dtype)


def _round_up(a, m):
    return (a + m - 1) // m * m


def mlp_forward(x, w1, b1, w2, b2, *, tm=512):
    """MLP forward.

    x : (..., in_features)
    w1: (hidden_features, in_features)   -- PyTorch nn.Linear weight layout
    b1: (hidden_features,)
    w2: (out_features, hidden_features)
    b2: (out_features,)
    Returns (..., out_features).
    """
    in_features = x.shape[-1]
    hidden = w1.shape[0]
    out_features = w2.shape[0]
    lead = x.shape[:-1]

    x2 = x.reshape(-1, in_features)
    n_tokens = x2.shape[0]
    itemsize = jnp.dtype(x.dtype).itemsize

    # Token tile: multiple of 128 (lane-dense blocks/stores); shrink for tiny
    # inputs so we don't pad a few tokens all the way up to `tm`.
    tm_eff = max(128, min(_round_up(tm, 128), _round_up(n_tokens, 128)))
    n_pad = _round_up(n_tokens, tm_eff)
    grid_len = n_pad // tm_eff

    # Tokens on the lane axis: x^T is (in, n_pad). Zero-pad the token axis; the
    # padded columns compute garbage that is sliced off below.
    xt = x2.T
    if n_pad != n_tokens:
        xt = jnp.pad(xt, ((0, 0), (0, n_pad - n_tokens)))         # (in, n_pad)
    b1_2d = b1.reshape(hidden, 1)
    b2_2d = b2.reshape(out_features, 1)

    # Advisory cost estimate for the XLA scheduler.
    flops = 2 * n_pad * (in_features * hidden + hidden * out_features)
    bytes_accessed = itemsize * (
        in_features * n_pad
        + in_features * hidden + hidden
        + hidden * out_features + out_features
        + out_features * n_pad)
    cost = pl.CostEstimate(flops=flops,
                           transcendentals=n_pad * hidden,
                           bytes_accessed=bytes_accessed)

    # VMEM budget: double-buffered x/out tiles + (double-buffered) loop-invariant
    # weights/biases + f32 activations, with generous margin for internal scratch.
    tile_bytes = 2 * itemsize * tm_eff * (in_features + out_features)
    wgt_bytes = 2 * itemsize * (in_features * hidden + hidden
                                + hidden * out_features + out_features)
    act_bytes = 4 * tm_eff * (hidden + out_features)
    vmem_limit = int(min(max(4 * (tile_bytes + wgt_bytes + act_bytes), 8 << 20),
                         64 << 20))

    ot = pl.pallas_call(
        _mlp_kernel,
        out_shape=jax.ShapeDtypeStruct((out_features, n_pad), x.dtype),
        grid_spec=pltpu.PrefetchScalarGridSpec(
            num_scalar_prefetch=0,
            grid=(grid_len,),
            in_specs=[
                pl.BlockSpec((in_features, tm_eff), lambda i: (0, i)),    # x^T tile
                pl.BlockSpec((hidden, in_features), lambda i: (0, 0)),    # w1 (full)
                pl.BlockSpec((hidden, 1), lambda i: (0, 0)),              # b1
                pl.BlockSpec((out_features, hidden), lambda i: (0, 0)),   # w2 (full)
                pl.BlockSpec((out_features, 1), lambda i: (0, 0)),        # b2
            ],
            out_specs=pl.BlockSpec((out_features, tm_eff), lambda i: (0, i)),
        ),
        compiler_params=pltpu.CompilerParams(
            dimension_semantics=("parallel",),   # token tiles shard across TCs
            vmem_limit_bytes=vmem_limit),
        cost_estimate=cost,
    )(xt, w1, b1_2d, w2, b2_2d)

    out = ot.T[:n_tokens]                        # (n_tokens, out_features)
    return out.reshape(*lead, out_features)


def _reference_mlp(x, w1, b1, w2, b2):
    # Pure-JAX reference with PyTorch nn.Linear weight layout (out, in).
    h = jnp.einsum("...i,hi->...h", x, w1) + b1
    h = 0.5 * h * (1.0 + jax.lax.erf(h / jnp.sqrt(2.0)))
    return jnp.einsum("...h,oh->...o", h, w2) + b2


if __name__ == "__main__":
    # Module config: in_features=16, hidden_features=32, out_features=16
    in_features, hidden_features, out_features = 16, 32, 16
    batch, seq = 2, 8  # 16 tokens total (exercises the padded / non-divisible path)

    key = jax.random.PRNGKey(0)
    kx, k1, k2, k3, k4 = jax.random.split(key, 5)

    x = jax.random.normal(kx, (batch, seq, in_features), dtype=jnp.float32)
    # Parameters in PyTorch nn.Linear layout: weight = (out, in)
    w1 = jax.random.normal(k1, (hidden_features, in_features), jnp.float32) * 0.05
    b1 = jax.random.normal(k2, (hidden_features,), jnp.float32) * 0.01
    w2 = jax.random.normal(k3, (out_features, hidden_features), jnp.float32) * 0.05
    b2 = jax.random.normal(k4, (out_features,), jnp.float32) * 0.01

    y = mlp_forward(x, w1, b1, w2, b2)
    y = jax.block_until_ready(y)

    y_ref = _reference_mlp(x, w1, b1, w2, b2)
    assert y.shape == (batch, seq, out_features)
    assert jnp.allclose(y, y_ref, atol=1e-5, rtol=1e-5), "mismatch vs reference"

    print("KERNEL_OK")
</pallas_src>

<mosaic_0001>
module attributes {stable_mosaic.version = 11 : i64} {
  func.func @_mlp_kernel(%arg0: i32, %arg1: memref<16x128xf32, #tpu.memory_space<vmem>>, %arg2: memref<32x16xf32, #tpu.memory_space<vmem>>, %arg3: memref<32x1xf32, #tpu.memory_space<vmem>>, %arg4: memref<16x32xf32, #tpu.memory_space<vmem>>, %arg5: memref<16x1xf32, #tpu.memory_space<vmem>>, %arg6: memref<16x128xf32, #tpu.memory_space<vmem>>) attributes {dimension_semantics = [#tpu.dimension_semantics<parallel>], iteration_bounds = array<i64: 1>, scalar_prefetch = 0 : i64, scratch_operands = 0 : i64, tpu.core_type = #tpu.core_type<tc>, window_params = [{transform_indices = @transform_0, window_bounds = array<i64: 16, 128>}, {pipeline_mode = #tpu.pipeline_mode<synchronous>, transform_indices = @transform_1, window_bounds = array<i64: 32, 16>}, {pipeline_mode = #tpu.pipeline_mode<synchronous>, transform_indices = @transform_2, window_bounds = array<i64: 32, 1>}, {pipeline_mode = #tpu.pipeline_mode<synchronous>, transform_indices = @transform_3, window_bounds = array<i64: 16, 32>}, {pipeline_mode = #tpu.pipeline_mode<synchronous>, transform_indices = @transform_4, window_bounds = array<i64: 16, 1>}, {transform_indices = @transform_5, window_bounds = array<i64: 16, 128>}]} {
    %c0 = arith.constant 0 : index
    %c0_0 = arith.constant 0 : index
    %0 = vector.load %arg2[%c0, %c0_0] : memref<32x16xf32, #tpu.memory_space<vmem>>, vector<32x16xf32>
    %c0_1 = arith.constant 0 : index
    %c0_2 = arith.constant 0 : index
    %1 = vector.load %arg1[%c0_1, %c0_2] : memref<16x128xf32, #tpu.memory_space<vmem>>, vector<16x128xf32>
    %cst = arith.constant dense<0.000000e+00> : vector<32x128xf32>
    %2 = tpu.matmul %0, %1, %cst {dimension_numbers = #tpu.dot_dimension_numbers<[1], [0], [0], [1], [0, 0, 1, 1], [], []>} : vector<32x16xf32>, vector<16x128xf32>, vector<32x128xf32> -> vector<32x128xf32>
    %c0_3 = arith.constant 0 : index
    %c0_4 = arith.constant 0 : index
    %3 = vector.load %arg3[%c0_3, %c0_4] : memref<32x1xf32, #tpu.memory_space<vmem>>, vector<32x1xf32>
    %4 = vector.broadcast %3 : vector<32x1xf32> to vector<32x128xf32>
    %5 = arith.addf %2, %4 : vector<32x128xf32>
    %cst_5 = arith.constant 5.000000e-01 : f32
    %6 = vector.broadcast %cst_5 : f32 to vector<32x128xf32>
    %7 = arith.mulf %6, %5 : vector<32x128xf32>
    %cst_6 = arith.constant 0.707106769 : f32
    %8 = vector.broadcast %cst_6 : f32 to vector<32x128xf32>
    %9 = arith.mulf %5, %8 : vector<32x128xf32>
    %10 = math.erf %9 : vector<32x128xf32>
    %cst_7 = arith.constant 1.000000e+00 : f32
    %11 = vector.broadcast %cst_7 : f32 to vector<32x128xf32>
    %12 = arith.addf %11, %10 : vector<32x128xf32>
    %13 = arith.mulf %7, %12 : vector<32x128xf32>
    %c0_8 = arith.constant 0 : index
    %c0_9 = arith.constant 0 : index
    %14 = vector.load %arg4[%c0_8, %c0_9] : memref<16x32xf32, #tpu.memory_space<vmem>>, vector<16x32xf32>
    %cst_10 = arith.constant dense<0.000000e+00> : vector<16x128xf32>
    %15 = tpu.matmul %14, %13, %cst_10 {dimension_numbers = #tpu.dot_dimension_numbers<[1], [0], [0], [1], [0, 0, 1, 1], [], []>} : vector<16x32xf32>, vector<32x128xf32>, vector<16x128xf32> -> vector<16x128xf32>
    %c0_11 = arith.constant 0 : index
    %c0_12 = arith.constant 0 : index
    %16 = vector.load %arg5[%c0_11, %c0_12] : memref<16x1xf32, #tpu.memory_space<vmem>>, vector<16x1xf32>
    %17 = vector.broadcast %16 : vector<16x1xf32> to vector<16x128xf32>
    %18 = arith.addf %15, %17 : vector<16x128xf32>
    %c0_13 = arith.constant 0 : index
    %c0_14 = arith.constant 0 : index
    %19 = vector.load %arg6[%c0_13, %c0_14] : memref<16x128xf32, #tpu.memory_space<vmem>>, vector<16x128xf32>
    tpu.vector_store %arg6[%c0_13, %c0_14], %18 {strides = array<i32>} : memref<16x128xf32, #tpu.memory_space<vmem>>, vector<16x128xf32>,
    return
  }
  func.func @transform_0(%arg0: i32) -> (i32, i32) {
    %c0_i32 = arith.constant 0 : i32
    %c0_i32_0 = arith.constant 0 : i32
    return %c0_i32, %arg0 : i32, i32
  }
  func.func @transform_1(%arg0: i32) -> (i32, i32) {
    %c0_i32 = arith.constant 0 : i32
    %c0_i32_0 = arith.constant 0 : i32
    %c0_i32_1 = arith.constant 0 : i32
    return %c0_i32, %c0_i32_0 : i32, i32
  }
  func.func @transform_2(%arg0: i32) -> (i32, i32) {
    %c0_i32 = arith.constant 0 : i32
    %c0_i32_0 = arith.constant 0 : i32
    %c0_i32_1 = arith.constant 0 : i32
    return %c0_i32, %c0_i32_0 : i32, i32
  }
  func.func @transform_3(%arg0: i32) -> (i32, i32) {
    %c0_i32 = arith.constant 0 : i32
    %c0_i32_0 = arith.constant 0 : i32
    %c0_i32_1 = arith.constant 0 : i32
    return %c0_i32, %c0_i32_0 : i32, i32
  }
  func.func @transform_4(%arg0: i32) -> (i32, i32) {
    %c0_i32 = arith.constant 0 : i32
    %c0_i32_0 = arith.constant 0 : i32
    %c0_i32_1 = arith.constant 0 : i32
    return %c0_i32, %c0_i32_0 : i32, i32
  }
  func.func @transform_5(%arg0: i32) -> (i32, i32) {
    %c0_i32 = arith.constant 0 : i32
    %c0_i32_0 = arith.constant 0 : i32
    return %c0_i32, %arg0 : i32, i32
  }
}

</mosaic_0001>

<bundles_post_ra>
// kernel: tpu_custom_call.1
= control target key start
LH: loop header
LB: loop body
LE: loop exit
PB: predicated region body
PF: predicated region fallthrough
CT: control target
= control target key end

     0   :  { %vm51_vm0 = vcmask 130048   ;;  %v390_v4 = vmov 0   ;;  %s601_s0 = inlined_call_operand.vmem [shape: f32[16,128], index: 0, kind: input, shape index: {}]   ;;  %s602_s1 = inlined_call_operand.vmem [shape: f32[32,16], index: 1, kind: input, shape index: {}]   ;;  %s603_s2 = inlined_call_operand.vmem [shape: f32[32,1], index: 2, kind: input, shape index: {}]   ;;  %s604_s3 = inlined_call_operand.vmem [shape: f32[16,32], index: 3, kind: input, shape index: {}]   ;;  %s605_s4 = inlined_call_operand.vmem [shape: f32[16,1], index: 4, kind: input, shape index: {}]   ;;  %s606_s5 = inlined_call_operand.hbm [shape: f32[16,128], index: 5, kind: output, shape index: {}]  }
   0x1   :  { %v26_v0 = vld [vmem:[%s601_s0 + $0x8] sm:$0xff]  ;;  %v25_v1 = vld [vmem:[%s601_s0] sm:$0xff]  ;;  %v23_v3 = vld [vmem:[%s602_s1 + $0x10] sm:$0xff]  ;;  %354 = vset.pattern.permute.xlu1 %v390_v4  ;;  %353 = vset.pattern.permute.xlu0 %v390_v4 }
   0x2   :  { %78 = vmatpush.msra.mxu0 %v26_v0  ;;  %343 = vmatpush.msra.mxu2 %v26_v0  ;;  %v21_v2 = vld [vmem:[%s602_s1] sm:$0xff]  ;;  %v28_v5 = vld [vmem:[%s603_s2 + $0x8] sm:$0xff]  ;;  %v30_v6 = vld [vmem:[%s603_s2 + $0x18] sm:$0xff] }
   0x4   :  { %79 = vmatpush.msra.mxu0 %v25_v1  ;;  %344 = vmatpush.msra.mxu2 %v25_v1 }
   0x5   :  { %10 = vsyncpa [#allocation3], 0  ;;  %333 = vmatmul.msk.f32.vlgmr.msra.gmra.mxu0 %vm51_vm0, %v21_v2  ;;  %335 = vmatmul.msk.f32.vlgmr.msra.gmra.mxu2 %vm51_vm0, %v23_v3  ;;  %v22_v7 = vld [vmem:[%s602_s1 + $0x8] sm:$0xff]  ;;  %v24_v8 = vld [vmem:[%s602_s1 + $0x18] sm:$0xff]  ;;  %s391_s17 = smov [#allocation2]   ;;  %s321_s21 = sshll.u32 %s606_s5, 4  ;;  %s322_s21 = int_to_ptr.hbm [resolvable:$true] %s321_s21 }
   0x6   :  { %38 = vperm.xlu1 %354, %v28_v5   ;;  %48 = vperm.xlu0 %353, %v30_v6   ;;  %v27_v9 = vld [vmem:[%s603_s2] sm:$0xff]  ;;  %v29_v10 = vld [vmem:[%s603_s2 + $0x10] sm:$0xff]  ;;  %s319_s18 = sshll.u32 %s391_s17, 4  ;;  %s393_s22 = smov 8   ;;  %s320_s18 = int_to_ptr.vmem [resolvable:$true] %s319_s18 }
   0x7   :  { %355 = vset.pattern.permute.xlu2 %v390_v4 }
   0xd   :  { %334 = vmatmul.msk.f32.gmra.mxu0 %vm51_vm0, %v22_v7  ;;  %336 = vmatmul.msk.f32.gmra.mxu2 %vm51_vm0, %v24_v8 }
   0xe   :  { %33 = vperm.xlu1 %354, %v27_v9   ;;  %43 = vperm.xlu0 %353, %v29_v10  }
  0x78   :  { %v39_v11 = vpop.permute.xlu1 %38  ;;  %v49_v12 = vpop.permute.xlu0 %48 }
  0x80   :  { %v34_v13 = vpop.permute.xlu1 %33  ;;  %v44_v17 = vpop.permute.xlu0 %43 }
  0x82   :  { %v81_v14 = vpop.f32.mrf.mxu0 }
  0x83   :  { %v458_v15 = vadd.f32 %v81_v14, %v34_v13 }
  0x85   :  { %v461_v16 = vmul.f32 0.70710677, %v458_v15 }
  0x87   :  { %v101_v18 = vmul.f32 %v461_v16, %v461_v16 }
  0x88   :  { %v87_v19 = vpop.f32.mrf.mxu2 }
  0x89   :  { %v465_v20 = vmin.f32 %v101_v18, 16.0  ;;  %v467_v21 = vadd.f32 %v87_v19, %v44_v17 }
  0x8a   :  { %v84_v22 = vpop.f32.mrf.mxu0 }
  0x8b   :  { %v103_v23 = vmul.f32 2.1237322e-06, %v465_v20  ;;  %v471_v24 = vmul.f32 0.70710677, %v467_v21  ;;  %v473_v25 = vadd.f32 %v84_v22, %v39_v11  ;;  %v114_v26 = vmul.f32 3.8918573e-05, %v465_v20 }
  0x8d   :  { %v181_v27 = vmul.f32 %v471_v24, %v471_v24  ;;  %v479_v28 = vmul.f32 0.70710677, %v473_v25  ;;  %v115_v29 = vadd.f32 0.001143296, %v114_v26  ;;  %v104_v30 = vadd.f32 0.00028619796, %v103_v23 }
  0x8f   :  { %v481_v31 = vmin.f32 %v181_v27, 16.0  ;;  %v141_v32 = vmul.f32 %v479_v28, %v479_v28  ;;  %v116_v34 = vmul.f32 %v115_v29, %v465_v20  ;;  %v105_v40 = vmul.f32 %v104_v30, %v465_v20 }
  0x90   :  { %v90_v33 = vpop.f32.mrf.mxu2 }
  0x91   :  { %v183_v35 = vmul.f32 2.1237322e-06, %v481_v31  ;;  %v487_v36 = vmin.f32 %v141_v32, 16.0  ;;  %v489_v37 = vadd.f32 %v90_v33, %v49_v12  ;;  %v194_v38 = vmul.f32 3.8918573e-05, %v481_v31 }
  0x92   :  { %v117_v39 = vadd.f32 0.014752088, %v116_v34  ;;  %v106_v53 = vadd.f32 0.0036580483, %v105_v40 }
  0x93   :  { %v184_v41 = vadd.f32 0.00028619796, %v183_v35  ;;  %v143_v42 = vmul.f32 2.1237322e-06, %v487_v36  ;;  %v495_v43 = vmul.f32 0.70710677, %v489_v37 }
  0x94   :  { %v195_v44 = vadd.f32 0.001143296, %v194_v38  ;;  %v154_v45 = vmul.f32 3.8918573e-05, %v487_v36  ;;  %v118_v46 = vmul.f32 %v117_v39, %v465_v20  ;;  %v107_v0 = vmul.f32 %v106_v53, %v465_v20 }
  0x95   :  { %v185_v47 = vmul.f32 %v184_v41, %v481_v31  ;;  %v144_v48 = vadd.f32 0.00028619796, %v143_v42  ;;  %v221_v49 = vmul.f32 %v495_v43, %v495_v43 }
  0x96   :  { %v196_v50 = vmul.f32 %v195_v44, %v481_v31  ;;  %v155_v51 = vadd.f32 0.001143296, %v154_v45  ;;  %v119_v52 = vadd.f32 0.112945676, %v118_v46  ;;  %v108_v13 = vadd.f32 0.05243302, %v107_v0 }
  0x97   :  { %v186_v54 = vadd.f32 0.0036580483, %v185_v47  ;;  %v145_v55 = vmul.f32 %v144_v48, %v487_v36  ;;  %v504_v56 = vmin.f32 %v221_v49, 16.0 }
  0x98   :  { %v197_v57 = vadd.f32 0.014752088, %v196_v50  ;;  %v156_v58 = vmul.f32 %v155_v51, %v487_v36  ;;  %v120_v59 = vmul.f32 %v119_v52, %v465_v20  ;;  %v109_v32 = vmul.f32 %v108_v13, %v465_v20 }
  0x99   :  { %v223_v60 = vmul.f32 2.1237322e-06, %v504_v56  ;;  %v234_v61 = vmul.f32 3.8918573e-05, %v504_v56  ;;  %v187_v1 = vmul.f32 %v186_v54, %v481_v31  ;;  %v146_v2 = vadd.f32 0.0036580483, %v145_v55 }
  0x9a   :  { %v198_v62 = vmul.f32 %v197_v57, %v481_v31  ;;  %v157_v63 = vadd.f32 0.014752088, %v156_v58  ;;  %v121_v3 = vadd.f32 0.4994258, %v120_v59  ;;  %v110_v44 = vadd.f32 0.18741608, %v109_v32 }
  0x9b   :  { %v224_v4 = vadd.f32 0.00028619796, %v223_v60  ;;  %v235_v5 = vadd.f32 0.001143296, %v234_v61  ;;  %v188_v14 = vadd.f32 0.05243302, %v187_v1  ;;  %v147_v17 = vmul.f32 %v146_v2, %v487_v36 }
  0x9c   :  { %v199_v6 = vadd.f32 0.112945676, %v198_v62  ;;  %v158_v7 = vmul.f32 %v157_v63, %v487_v36  ;;  %v122_v8 = vmul.f32 %v121_v3, %v465_v20  ;;  %v111_v52 = vmul.f32 %v110_v44, %v465_v20  ;;  %v271_v61 = vld [vmem:[%s605_s4] sm:$0xff] }
  0x9d   :  { %v225_v9 = vmul.f32 %v224_v4, %v504_v56  ;;  %v236_v10 = vmul.f32 %v235_v5, %v504_v56  ;;  %v189_v33 = vmul.f32 %v188_v14, %v481_v31  ;;  %v148_v35 = vadd.f32 0.05243302, %v147_v17  ;;  %275 = vperm.xlu2 %355, %v271_v61  }
  0x9e   :  { %v200_v11 = vmul.f32 %v199_v6, %v481_v31  ;;  %v159_v12 = vadd.f32 0.112945676, %v158_v7  ;;  %v519_v18 = vadd.f32 1.0, %v122_v8  ;;  %v112_v63 = vadd.f32 1.1283791, %v111_v52 }
  0x9f   :  { %v226_v19 = vadd.f32 0.0036580483, %v225_v9  ;;  %v237_v22 = vadd.f32 0.014752088, %v236_v10  ;;  %v190_v47 = vadd.f32 0.18741608, %v189_v33  ;;  %v149_v48 = vmul.f32 %v148_v35, %v487_v36 }
  0xa0   :  { %v201_v23 = vadd.f32 0.4994258, %v200_v11  ;;  %v160_v26 = vmul.f32 %v159_v12, %v487_v36  ;;  %356 = vrcp.f32 %v519_v18  ;;  %vm129_vm1 = vweird.f32 %v519_v18 }
  0xa1   :  { %v238_v27 = vmul.f32 %v237_v22, %v504_v56  ;;  %v227_v34 = vmul.f32 %v226_v19, %v504_v56  ;;  %v191_v55 = vmul.f32 %v190_v47, %v481_v31  ;;  %v150_v57 = vadd.f32 0.18741608, %v149_v48  ;;  %v272_v22 = vld [vmem:[%s605_s4 + $0x8] sm:$0xff] }
  0xa2   :  { %v202_v29 = vmul.f32 %v201_v23, %v481_v31  ;;  %v161_v30 = vadd.f32 0.4994258, %v160_v26  ;;  %v133_v5 = vand.u32 2147483647, %v519_v18  ;;  %v135_v8 = vand.u32 2147483648, %v519_v18 }
  0xa3   :  { %v239_v38 = vadd.f32 0.112945676, %v238_v27  ;;  %v228_v45 = vadd.f32 0.05243302, %v227_v34  ;;  %v192_v1 = vadd.f32 1.1283791, %v191_v55  ;;  %v151_v2 = vmul.f32 %v150_v57, %v487_v36 }
  0xa4   :  { %v203_v39 = vadd.f32 1.0, %v202_v29  ;;  %v162_v40 = vmul.f32 %v161_v30, %v487_v36  ;;  %vm134_vm13 = vcmp.eq.f32.partialorder %v133_v5, 8.507059e+37  ;;  %v96_v61 = vmul.f32 0.5, %v489_v37 }
  0xa5   :  { %v240_v41 = vmul.f32 %v239_v38, %v504_v56  ;;  %v229_v53 = vmul.f32 %v228_v45, %v504_v56  ;;  %v193_v13 = vmul.f32 %v192_v1, %v471_v24  ;;  %v152_v24 = vadd.f32 1.1283791, %v151_v2  ;;  %280 = vperm.xlu2 %355, %v272_v22  }
  0xa6   :  { %358 = vrcp.f32 %v203_v39  ;;  %v530_v42 = vpop.eup %356  ;;  %v532_v46 = vadd.f32 1.0, %v162_v40  ;;  %vm209_vm3 = vweird.f32 %v203_v39  ;;  %v215_v6 = vand.u32 2147483648, %v203_v39 }
  0xa7   :  { %v241_v49 = vadd.f32 0.4994258, %v240_v41  ;;  %v125_v50 = vmul.f32 %v530_v42, %v519_v18  ;;  %v230_v0 = vadd.f32 0.18741608, %v229_v53  ;;  %v213_v11 = vand.u32 2147483647, %v203_v39 }
  0xa8   :  { %360 = vrcp.f32 %v532_v46  ;;  %v173_v36 = vand.u32 2147483647, %v532_v46  ;;  %v175_v19 = vand.u32 2147483648, %v532_v46  ;;  %vm130_vm6 = vweird.f32 %v530_v42 }
  0xa9   :  { %v242_v51 = vmul.f32 %v241_v49, %v504_v56  ;;  %v126_v60 = vsub.f32 1.0, %v125_v50  ;;  %v231_v9 = vmul.f32 %v230_v0, %v504_v56  ;;  %v216_v27 = vor.u32 1.1754944e-38, %v215_v6  ;;  %vm576_vm11 = vmor %vm129_vm1, %vm130_vm6 }
  0xaa   :  { %vm169_vm7 = vweird.f32 %v532_v46  ;;  %vm214_vm8 = vcmp.eq.f32.partialorder %v213_v11, 8.507059e+37  ;;  %vm174_vm10 = vcmp.eq.f32.partialorder %v173_v36, 8.507059e+37  ;;  %v176_v38 = vor.u32 1.1754944e-38, %v175_v19 }
  0xab   :  { %v542_v58 = vadd.f32 1.0, %v242_v51  ;;  %v127_v4 = vmul.f32 %v530_v42, %v126_v60  ;;  %v232_v30 = vadd.f32 1.1283791, %v231_v9  ;;  %v153_v47 = vmul.f32 %v152_v24, %v479_v28 }
  0xac   :  { %v359_v54 = vpop.eup %358  ;;  %v113_v49 = vmul.f32 %v112_v63, %v461_v16  ;;  %v95_v16 = vmul.f32 0.5, %v467_v21  ;;  %v269_v21 = vld [vmem:[%s604_s3] sm:$0xff]  ;;  %vm283_vm1 = vcmask 261120  }
  0xad   :  { %v205_v59 = vmul.f32 %v359_v54, %v203_v39  ;;  %362 = vrcp.f32 %v542_v58  ;;  %vm210_vm2 = vweird.f32 %v359_v54  ;;  %v128_v26 = vadd.f32 %v530_v42, %v127_v4 }
  0xae   :  { %v361_v62 = vpop.eup %360  ;;  %vm557_vm4 = vmor %vm209_vm3, %vm210_vm2  ;;  %v255_v33 = vand.u32 2147483648, %v542_v58  ;;  %v253_v41 = vand.u32 2147483647, %v542_v58  ;;  %vm249_vm14 = vweird.f32 %v542_v58  ;;  %v233_v52 = vmul.f32 %v232_v30, %v495_v43 }
  0xaf   :  { %v206_v20 = vsub.f32 1.0, %v205_v59  ;;  %v165_v31 = vmul.f32 %v361_v62, %v532_v46  ;;  %vm170_vm5 = vweird.f32 %v361_v62  ;;  %v132_v44 = vsel %vm576_vm11, %v530_v42, %v128_v26 }
  0xb0   :  { %vm171_vm9 = vmor %vm169_vm7, %vm170_vm5  ;;  %v136_v46 = vor.u32 1.1754944e-38, %v135_v8  ;;  %v256_v50 = vor.u32 1.1754944e-38, %v255_v33  ;;  %vm254_vm0 = vcmp.eq.f32.partialorder %v253_v41, 8.507059e+37  ;;  %v94_v43 = vmul.f32 0.5, %v473_v25  ;;  %v270_v25 = vld [vmem:[%s604_s3 + $0x8] sm:$0xff]  ;;  %s392_s3 = smov 128  }
  0xb1   :  { %v207_v3 = vmul.f32 %v359_v54, %v206_v20  ;;  %v166_v7 = vsub.f32 1.0, %v165_v31  ;;  %v93_v31 = vmul.f32 0.5, %v458_v15 }
  0xb2   :  { %v137_v51 = vsel %vm134_vm13, %v136_v46, %v132_v44 }
  0xb3   :  { %v208_v10 = vadd.f32 %v359_v54, %v207_v3  ;;  %v363_v12 = vpop.eup %362  ;;  %v167_v17 = vmul.f32 %v361_v62, %v166_v7  ;;  %v138_v59 = vmul.f32 %v137_v51, %v113_v49 }
  0xb4   :  { %v245_v56 = vmul.f32 %v363_v12, %v542_v58  ;;  %vm250_vm12 = vweird.f32 %v363_v12 }
  0xb5   :  { %v212_v23 = vsel %vm557_vm4, %v359_v54, %v208_v10  ;;  %v168_v29 = vadd.f32 %v361_v62, %v167_v17  ;;  %vm251_vm15 = vmor %vm249_vm14, %vm250_vm12  ;;  %v337_v0 = vclamps-f32 %v138_v59, 1.0 }
  0xb6   :  { %v246_v32 = vsub.f32 1.0, %v245_v56  ;;  %v217_v34 = vsel %vm214_vm8, %v216_v27, %v212_v23 }
  0xb7   :  { %v172_v35 = vsel %vm171_vm9, %v361_v62, %v168_v29  ;;  %v218_v18 = vmul.f32 %v217_v34, %v193_v13  ;;  %v261_v2 = vadd.f32 1.0, %v337_v0 }
  0xb8   :  { %v247_v40 = vmul.f32 %v363_v12, %v246_v32  ;;  %v177_v45 = vsel %vm174_vm10, %v176_v38, %v172_v35 }
  0xb9   :  { %v178_v54 = vmul.f32 %v177_v45, %v153_v47  ;;  %v339_v57 = vclamps-f32 %v218_v18, 1.0  ;;  %v265_v37 = vmul.f32 %v261_v2, %v93_v31 }
  0xba   :  { %v248_v48 = vadd.f32 %v363_v12, %v247_v40 }
  0xbb   :  { %v338_v28 = vclamps-f32 %v178_v54, 1.0  ;;  %v263_v62 = vadd.f32 1.0, %v339_v57 }
  0xbc   :  { %v252_v53 = vsel %vm251_vm15, %v363_v12, %v248_v48 }
  0xbd   :  { %v257_v42 = vsel %vm254_vm0, %v256_v50, %v252_v53  ;;  %v262_v20 = vadd.f32 1.0, %v338_v28  ;;  %v267_v1 = vmul.f32 %v263_v62, %v95_v16 }
  0xbe   :  { %v258_v55 = vmul.f32 %v257_v42, %v233_v52 }
  0xbf   :  { %v266_v3 = vmul.f32 %v262_v20, %v94_v43 }
  0xc0   :  { %v340_v60 = vclamps-f32 %v258_v55, 1.0 }
  0xc2   :  { %v264_v58 = vadd.f32 1.0, %v340_v60 }
  0xc4   :  { %v268_v63 = vmul.f32 %v264_v58, %v96_v61 }
  0xc6   :  { %302 = vmatpush.msra.mxu1 %v268_v63  ;;  %345 = vmatpush.msra.mxu3 %v268_v63 }
  0xc8   :  { %303 = vmatpush.msra.mxu1 %v267_v1  ;;  %346 = vmatpush.msra.mxu3 %v267_v1 }
  0xca   :  { %304 = vmatpush.msra.mxu1 %v266_v3  ;;  %347 = vmatpush.msra.mxu3 %v266_v3 }
  0xcc   :  { %305 = vmatpush.msra.mxu1 %v265_v37  ;;  %348 = vmatpush.msra.mxu3 %v265_v37 }
  0xcd   :  { %341 = vmatmul.msk.f32.vlgmr.msra.gmra.mxu1 %vm283_vm1, %v269_v21  ;;  %342 = vmatmul.msk.f32.vlgmr.msra.gmra.mxu3 %vm283_vm1, %v270_v25 }
  0xf7   :  { %v276_v15 = vpop.permute.xlu2 %275 }
  0xff   :  { %v281_v6 = vpop.permute.xlu2 %280 }
 0x14a   :  { %v307_v4 = vpop.f32.mrf.mxu1 }
 0x14b   :  { %v308_v5 = vadd.f32 %v307_v4, %v276_v15 }
 0x14d   :  { %313 = vst [vmem:[#allocation2] sm:$0xff] %v308_v5 }
 0x150   :  { %v310_v7 = vpop.f32.mrf.mxu3 }
 0x151   :  { %v311_v8 = vadd.f32 %v310_v7, %v281_v6 }
 0x153   :  { %314 = vst [vmem:[#allocation2 + $0x8] sm:$0xff] %v311_v8 }
 0x154   :  { %327 = dma.vmem_to_hbm [thread:$0]  %s320_s18, 256, %s322_s21, [#allocation3], %s392_s3, %s392_s3, %s393_s22  }
 0x155   :  { %388 = dma.done.wait [#allocation3], 256  }
 0x156   :  { %389 = vsyncadd [#allocation3], 4294967040 }
 0x157   :  { %332 = vsyncpa [#allocation3], 1 }

</bundles_post_ra>
